<compile_context>
chip_gen: v5e
topology: v5e:2x2
jax: 0.10.0
libtpu: 0.0.40
codegen_flags: <defaults>
</compile_context>

<pallas_src>
import jax
import jax.numpy as jnp
from jax.experimental import pallas as pl
from jax.experimental.pallas import tpu as pltpu


# ----------------------------------------------------------------------------- helpers
def _round_up(x, m):
    return ((x + m - 1) // m) * m


def _largest_aligned_divisor(padded, limit, align=128):
    """Largest multiple of `align` that divides `padded` and is <= limit."""
    m = padded // align
    best = 1
    for d in range(1, m + 1):
        if m % d == 0 and d * align <= limit:
            best = d
    return best * align


def _next_smaller_divisor(padded, current, align=128):
    """Largest multiple-of-`align` divisor of `padded` strictly smaller than `current`."""
    m = padded // align
    cur = current // align
    best = None
    for d in range(1, cur):
        if m % d == 0:
            best = d
    return (best * align) if best is not None else current


def _tpu_vmem_bytes():
    """Physical VMEM per TensorCore; v7x-safe 64 MiB fallback if query fails."""
    default = 64 * 1024 * 1024
    try:
        info = pltpu.get_tpu_info()
        return int(getattr(info, "vmem_capacity_bytes", default))
    except Exception:
        return default


# ----------------------------------------------------------------------------- kernels
def _dense_block_kernel_kloop(x_ref, w_ref, bss_ref, o_ref, acc_ref):
    # x_ref:   (BN, BK)  input tile (compute dtype, e.g. bf16)
    # w_ref:   (BK, BO)  weight tile, pre-transposed to (in_chan, out_chan)
    # bss_ref: (8,  BO)  rows 0/1/2 = linear bias / bn scale / bn shift (f32)
    # o_ref:   (BN, BO)  output tile
    # acc_ref: (BN, BO)  f32 accumulator, resident across the K axis
    k = pl.program_id(2)

    @pl.when(k == 0)
    def _():
        acc_ref[...] = jnp.zeros_like(acc_ref)

    acc_ref[...] += jnp.dot(x_ref[...], w_ref[...],
                            preferred_element_type=jnp.float32)

    @pl.when(k == pl.num_programs(2) - 1)
    def _():
        bss = bss_ref[...]                      # f32 epilogue (v5e-safe)
        y = acc_ref[...] + bss[0:1, :]          # Linear bias
        y = jnp.maximum(y, 0.0)                 # ReLU
        y = y * bss[1:2, :] + bss[2:3, :]       # folded BatchNorm1d (eval)
        o_ref[...] = y.astype(o_ref.dtype)      # Dropout(eval) == identity


def _dense_block_kernel_single_k(x_ref, w_ref, bss_ref, o_ref):
    # Fast path: whole K fits one tile -> no scratch, no pl.when.
    y = jnp.dot(x_ref[...], w_ref[...], preferred_element_type=jnp.float32)
    bss = bss_ref[...]
    y = y + bss[0:1, :]
    y = jnp.maximum(y, 0.0)
    y = y * bss[1:2, :] + bss[2:3, :]
    o_ref[...] = y.astype(o_ref.dtype)


# ----------------------------------------------------------------------------- wrappers
def pack_dense_block_params(weight, bias, gamma, beta, running_mean, running_var,
                            eps=1e-5, *, compute_dtype=jnp.bfloat16):
    """One-time parameter packing (call at setup, NOT per forward).

    weight: (out_chan, in_chan) as in nn.Linear. Returns a dict with the padded
    transposed weight slab (Kp, Op) in `compute_dtype` and the fused
    bias|bn_scale|bn_shift rows (8, Op) in f32.
    """
    out_chan, in_chan = weight.shape
    Kp = _round_up(in_chan, 128)
    Op = _round_up(out_chan, 128)

    scale = gamma / jnp.sqrt(running_var + eps)
    shift = beta - running_mean * scale
    bss = jnp.zeros((8, Op), jnp.float32)
    bss = bss.at[0, :out_chan].set(bias.astype(jnp.float32))
    bss = bss.at[1, :out_chan].set(scale.astype(jnp.float32))
    bss = bss.at[2, :out_chan].set(shift.astype(jnp.float32))

    w_p = jnp.zeros((Kp, Op), compute_dtype).at[:in_chan, :out_chan].set(
        weight.T.astype(compute_dtype))

    return dict(w=w_p, bss=bss, in_chan=in_chan, out_chan=out_chan,
                compute_dtype=compute_dtype)


def dense_block_forward_packed(x, packed, *, block_n=1024, block_o=1024,
                               block_k=512, out_dtype=None, weight_buffers=2,
                               assume_cores=2):
    """x: (N, in_chan). Returns (N, out_chan). Uses pre-packed params."""
    N, in_chan_x = x.shape
    in_chan = packed["in_chan"]
    out_chan = packed["out_chan"]
    assert in_chan_x == in_chan, "x last dim must match packed in_chan"
    w_p, bss = packed["w"], packed["bss"]
    compute_dtype = packed["compute_dtype"]
    Kp, Op = w_p.shape
    out_dtype = x.dtype if out_dtype is None else out_dtype

    in_sz = jnp.dtype(compute_dtype).itemsize
    out_sz = jnp.dtype(out_dtype).itemsize

    # --- tile sizes: rows in 16-multiples, lane dims in 128-multiple divisors ---
    bn = _round_up(min(block_n, _round_up(N, 16)), 16)
    bo = _largest_aligned_divisor(Op, block_o)
    bk = _largest_aligned_divisor(Kp, block_k)
    Np = _round_up(N, bn)

    # --- v7x megacore: make sure the parallel grid has >= 2 blocks ---
    if assume_cores >= 2 and (Np // bn) * (Op // bo) < 2:
        if bo >= 256:
            bo2 = _largest_aligned_divisor(Op, bo // 2)
            if Op // bo2 >= 2:
                bo = bo2
        elif bn >= 32:
            bn = _round_up(bn // 2, 16)
            Np = _round_up(N, bn)

    # --- generation-aware VMEM budget; shrink tiles until they fit ---
    physical_vmem = _tpu_vmem_bytes()
    budget = int(physical_vmem * 0.6)
    w_bufs = max(2, weight_buffers)

    def vmem_need(bn_, bo_, bk_, with_acc):
        need = (2 * bn_ * bk_ * in_sz            # x tiles (double-buffered)
                + w_bufs * bk_ * bo_ * in_sz     # weight tiles
                + 2 * bn_ * bo_ * out_sz         # output tiles
                + 2 * 8 * bo_ * 4)               # bias|scale|shift rows
        if with_acc:
            need += bn_ * bo_ * 4                # f32 accumulator scratch
        return need

    while vmem_need(bn, bo, bk, Kp > bk) > budget:
        if bn > 16:
            bn = _round_up(bn // 2, 16)
        elif bo > 128:
            bo = _next_smaller_divisor(Op, bo)
        elif bk > 128:
            bk = _next_smaller_divisor(Kp, bk)
        else:
            break
    Np = _round_up(N, bn)

    n_i, n_j, n_k = Np // bn, Op // bo, Kp // bk

    # --- x: cast only when already aligned, pad otherwise ---
    if Np == N and Kp == in_chan:
        x_p = x if x.dtype == compute_dtype else x.astype(compute_dtype)
    else:
        x_p = jnp.zeros((Np, Kp), compute_dtype).at[:N, :in_chan].set(
            x.astype(compute_dtype))

    # --- advisory cost estimate (includes tile re-reads) ---
    cost = pl.CostEstimate(
        flops=2 * Np * Kp * Op,
        transcendentals=0,
        bytes_accessed=(Np * Kp * in_sz * n_j       # x re-read per out-col tile
                        + Kp * Op * in_sz * n_i     # w re-read per row tile
                        + Np * Op * out_sz))

    vmem_limit = int(min(max(int(1.5 * vmem_need(bn, bo, bk, n_k > 1)),
                             16 * 1024 * 1024),
                         int(physical_vmem * 0.75)))

    w_spec_kwargs = {}
    if weight_buffers != 2:
        # Optional deeper prefetch on the weight stream (sweep if DMA exposed).
        w_spec_kwargs["pipeline_mode"] = pl.Buffered(weight_buffers)

    if n_k == 1:
        # Single-K fast path: 2-D grid, no accumulator scratch.
        out = pl.pallas_call(
            _dense_block_kernel_single_k,
            out_shape=jax.ShapeDtypeStruct((Np, Op), out_dtype),
            grid_spec=pltpu.PrefetchScalarGridSpec(
                num_scalar_prefetch=0,
                grid=(n_i, n_j),
                in_specs=[
                    pl.BlockSpec((bn, bk), lambda i, j: (i, 0)),                   # x
                    pl.BlockSpec((bk, bo), lambda i, j: (0, j), **w_spec_kwargs),  # W^T
                    pl.BlockSpec((8, bo), lambda i, j: (0, j)),                    # b|s|s
                ],
                out_specs=pl.BlockSpec((bn, bo), lambda i, j: (i, j)),
            ),
            compiler_params=pltpu.CompilerParams(
                dimension_semantics=("parallel", "parallel"),
                vmem_limit_bytes=vmem_limit),
            cost_estimate=cost,
        )(x_p, w_p, bss)
    else:
        out = pl.pallas_call(
            _dense_block_kernel_kloop,
            out_shape=jax.ShapeDtypeStruct((Np, Op), out_dtype),
            grid_spec=pltpu.PrefetchScalarGridSpec(
                num_scalar_prefetch=0,
                grid=(n_i, n_j, n_k),
                in_specs=[
                    pl.BlockSpec((bn, bk), lambda i, j, k: (i, k)),                   # x
                    pl.BlockSpec((bk, bo), lambda i, j, k: (k, j), **w_spec_kwargs),  # W^T
                    pl.BlockSpec((8, bo), lambda i, j, k: (0, j)),                    # b|s|s
                ],
                out_specs=pl.BlockSpec((bn, bo), lambda i, j, k: (i, j)),
                scratch_shapes=[pltpu.VMEM((bn, bo), jnp.float32)],
            ),
            compiler_params=pltpu.CompilerParams(
                dimension_semantics=("parallel", "parallel", "arbitrary"),
                vmem_limit_bytes=vmem_limit),
            cost_estimate=cost,
        )(x_p, w_p, bss)

    if Np != N or Op != out_chan:
        out = out[:N, :out_chan]
    return out


def dense_block_forward(x, weight, bias, gamma, beta, running_mean, running_var,
                        eps=1e-5, *, compute_dtype=jnp.bfloat16, **kwargs):
    """Convenience wrapper (packs params per call; prefer pack_dense_block_params
    once at setup + dense_block_forward_packed per step)."""
    packed = pack_dense_block_params(weight, bias, gamma, beta, running_mean,
                                     running_var, eps, compute_dtype=compute_dtype)
    return dense_block_forward_packed(x, packed, **kwargs)


# ----------------------------------------------------------------------------- test
if __name__ == "__main__":
    key = jax.random.PRNGKey(0)

    def make_params(key, in_chan, out_chan):
        k_w, k_b, k_g, k_be, k_m, k_v = jax.random.split(key, 6)
        weight = jax.random.normal(k_w, (out_chan, in_chan), jnp.float32) * 0.1
        bias = jax.random.normal(k_b, (out_chan,), jnp.float32) * 0.1
        gamma = 1.0 + 0.1 * jax.random.normal(k_g, (out_chan,), jnp.float32)
        beta = 0.1 * jax.random.normal(k_be, (out_chan,), jnp.float32)
        rmean = 0.1 * jax.random.normal(k_m, (out_chan,), jnp.float32)
        rvar = jnp.abs(1.0 + 0.1 * jax.random.normal(k_v, (out_chan,), jnp.float32))
        return weight, bias, gamma, beta, rmean, rvar

    def reference(x, weight, bias, gamma, beta, rmean, rvar, eps=1e-5):
        y = jnp.maximum(x @ weight.T + bias, 0.0)
        return gamma * (y - rmean) / jnp.sqrt(rvar + eps) + beta

    # ---- case 1: small DenseBlock, exercises the single-K fast path ----
    k0, k1, k2, k3 = jax.random.split(key, 4)
    N, in_chan, out_chan = 16, 32, 64
    x = jax.random.normal(k0, (N, in_chan), jnp.float32)
    params = make_params(k1, in_chan, out_chan)
    ref = reference(x, *params)

    packed_f32 = pack_dense_block_params(*params, compute_dtype=jnp.float32)
    out_f32 = jax.block_until_ready(dense_block_forward_packed(x, packed_f32))
    assert out_f32.shape == (N, out_chan)
    assert jnp.allclose(out_f32, ref, atol=1e-5, rtol=1e-5)

    packed_bf16 = pack_dense_block_params(*params, compute_dtype=jnp.bfloat16)
    out_bf16 = jax.block_until_ready(dense_block_forward_packed(x, packed_bf16))
    assert out_bf16.shape == (N, out_chan)
    assert jnp.allclose(out_bf16, ref, atol=3e-2, rtol=3e-2)

    # ---- case 2: exercises the K-loop kernel + megacore output split ----
    N2, in_chan2, out_chan2 = 32, 256, 192
    x2 = jax.random.normal(k2, (N2, in_chan2), jnp.float32)
    params2 = make_params(k3, in_chan2, out_chan2)
    ref2 = reference(x2, *params2)

    packed2 = pack_dense_block_params(*params2, compute_dtype=jnp.float32)
    out2 = jax.block_until_ready(
        dense_block_forward_packed(x2, packed2, block_k=128))
    assert out2.shape == (N2, out_chan2)
    assert jnp.allclose(out2, ref2, atol=1e-5, rtol=1e-5)

    # Convenience (per-call packing) wrapper still works.
    out3 = jax.block_until_ready(
        dense_block_forward(x, *params, compute_dtype=jnp.bfloat16))
    assert jnp.allclose(out3, ref, atol=3e-2, rtol=3e-2)

    print("KERNEL_OK")
</pallas_src>

<mosaic_0001>
module attributes {stable_mosaic.version = 11 : i64} {
  func.func @_dense_block_kernel_single_k(%arg0: i32, %arg1: i32, %arg2: memref<16x128xf32, #tpu.memory_space<vmem>>, %arg3: memref<128x128xf32, #tpu.memory_space<vmem>>, %arg4: memref<8x128xf32, #tpu.memory_space<vmem>>, %arg5: memref<16x128xf32, #tpu.memory_space<vmem>>) attributes {dimension_semantics = [#tpu.dimension_semantics<parallel>, #tpu.dimension_semantics<parallel>], iteration_bounds = array<i64: 1, 1>, scalar_prefetch = 0 : i64, scratch_operands = 0 : i64, tpu.core_type = #tpu.core_type<tc>, window_params = [{transform_indices = @transform_0, window_bounds = array<i64: 16, 128>}, {transform_indices = @transform_1, window_bounds = array<i64: 128, 128>}, {transform_indices = @transform_2, window_bounds = array<i64: 8, 128>}, {transform_indices = @transform_3, window_bounds = array<i64: 16, 128>}]} {
    %c0 = arith.constant 0 : index
    %c0_0 = arith.constant 0 : index
    %0 = vector.load %arg2[%c0, %c0_0] : memref<16x128xf32, #tpu.memory_space<vmem>>, vector<16x128xf32>
    %c0_1 = arith.constant 0 : index
    %c0_2 = arith.constant 0 : index
    %1 = vector.load %arg3[%c0_1, %c0_2] : memref<128x128xf32, #tpu.memory_space<vmem>>, vector<128x128xf32>
    %cst = arith.constant dense<0.000000e+00> : vector<16x128xf32>
    %2 = tpu.matmul %0, %1, %cst {dimension_numbers = #tpu.dot_dimension_numbers<[1], [0], [0], [1], [0, 0, 1, 1], [], []>} : vector<16x128xf32>, vector<128x128xf32>, vector<16x128xf32> -> vector<16x128xf32>
    %c0_3 = arith.constant 0 : index
    %c0_4 = arith.constant 0 : index
    %3 = vector.load %arg4[%c0_3, %c0_4] : memref<8x128xf32, #tpu.memory_space<vmem>>, vector<8x128xf32>
    %4 = vector.extract_strided_slice %3 {offsets = [0, 0], sizes = [1, 128], strides = [1, 1]} : vector<8x128xf32> to vector<1x128xf32>
    %5 = vector.broadcast %4 : vector<1x128xf32> to vector<16x128xf32>
    %6 = arith.addf %2, %5 : vector<16x128xf32>
    %cst_5 = arith.constant 0.000000e+00 : f32
    %7 = vector.broadcast %cst_5 : f32 to vector<16x128xf32>
    %8 = arith.maximumf %6, %7 : vector<16x128xf32>
    %9 = vector.extract_strided_slice %3 {offsets = [1, 0], sizes = [1, 128], strides = [1, 1]} : vector<8x128xf32> to vector<1x128xf32>
    %10 = vector.broadcast %9 : vector<1x128xf32> to vector<16x128xf32>
    %11 = arith.mulf %8, %10 : vector<16x128xf32>
    %12 = vector.extract_strided_slice %3 {offsets = [2, 0], sizes = [1, 128], strides = [1, 1]} : vector<8x128xf32> to vector<1x128xf32>
    %13 = vector.broadcast %12 : vector<1x128xf32> to vector<16x128xf32>
    %14 = arith.addf %11, %13 : vector<16x128xf32>
    %c0_6 = arith.constant 0 : index
    %c0_7 = arith.constant 0 : index
    %15 = vector.load %arg5[%c0_6, %c0_7] : memref<16x128xf32, #tpu.memory_space<vmem>>, vector<16x128xf32>
    tpu.vector_store %arg5[%c0_6, %c0_7], %14 {strides = array<i32>} : memref<16x128xf32, #tpu.memory_space<vmem>>, vector<16x128xf32>,
    return
  }
  func.func @transform_0(%arg0: i32, %arg1: i32) -> (i32, i32) {
    %c0_i32 = arith.constant 0 : i32
    %c0_i32_0 = arith.constant 0 : i32
    return %arg0, %c0_i32 : i32, i32
  }
  func.func @transform_1(%arg0: i32, %arg1: i32) -> (i32, i32) {
    %c0_i32 = arith.constant 0 : i32
    %c0_i32_0 = arith.constant 0 : i32
    return %c0_i32, %arg1 : i32, i32
  }
  func.func @transform_2(%arg0: i32, %arg1: i32) -> (i32, i32) {
    %c0_i32 = arith.constant 0 : i32
    %c0_i32_0 = arith.constant 0 : i32
    return %c0_i32, %arg1 : i32, i32
  }
  func.func @transform_3(%arg0: i32, %arg1: i32) -> (i32, i32) {
    %c0_i32 = arith.constant 0 : i32
    return %arg0, %arg1 : i32, i32
  }
}

</mosaic_0001>

<bundles_post_ra>
// kernel: tpu_custom_call.1
= control target key start
LH: loop header
LB: loop body
LE: loop exit
PB: predicated region body
PF: predicated region fallthrough
CT: control target
= control target key end

     0   :  { %8 = vsyncpa [#allocation3], 0  ;;  %s304_s0 = inlined_call_operand.hbm [shape: f32[16,128], index: 0, kind: input, shape index: {}]   ;;  %s305_s1 = inlined_call_operand.hbm [shape: f32[128,128], index: 1, kind: input, shape index: {}]   ;;  %s306_s2 = inlined_call_operand.hbm [shape: f32[8,128], index: 2, kind: input, shape index: {}]   ;;  %s307_s3 = inlined_call_operand.hbm [shape: f32[16,128], index: 3, kind: output, shape index: {}]  }
   0x1   :  { %9 = vsyncpa [#allocation6], 0 }
   0x2   :  { %10 = vsyncpa [#allocation4], 0  ;;  %s28_s14 = sshll.u32 %s305_s1, 4  ;;  %s257_s15 = smov [#allocation5]   ;;  %s29_s14 = int_to_ptr.hbm [resolvable:$true] %s28_s14 }
   0x3   :  { %s30_s16 = sshll.u32 %s257_s15, 4  ;;  %s15_s19 = sshll.u32 %s304_s0, 4  ;;  %s31_s16 = int_to_ptr.vmem [resolvable:$true] %s30_s16  ;;  %s16_s19 = int_to_ptr.hbm [resolvable:$true] %s15_s19 }
   0x4   :  { %s258_s20 = smov 128   ;;  %s259_s21 = smov 8  }
   0x5   :  { %36 = dma.hbm_to_vmem [thread:$0]  %s29_s14, 2048, %s31_s16, [#allocation6], %s258_s20, %s258_s20, %s259_s21  }
   0x6   :  { %s260_s22 = smov [#allocation2]   ;;  %s42_s1 = sshll.u32 %s306_s2, 4  ;;  %s43_s1 = int_to_ptr.hbm [resolvable:$true] %s42_s1 }
   0x7   :  { %s17_s23 = sshll.u32 %s260_s22, 4  ;;  %s261_s0 = smov [#allocation7]   ;;  %s18_s23 = int_to_ptr.vmem [resolvable:$true] %s17_s23 }
   0x8   :  { %23 = dma.hbm_to_vmem [thread:$0]  %s16_s19, 256, %s18_s23, [#allocation3], %s258_s20, %s258_s20, %s259_s21  }
   0x9   :  { %s44_s26 = sshll.u32 %s261_s0, 4  ;;  %s45_s26 = int_to_ptr.vmem [resolvable:$true] %s44_s26 }
   0xa   :  { %47 = dma.hbm_to_vmem [thread:$0]  %s43_s1, 128, %s45_s26, [#allocation6]  }
   0xb   :  { %251 = dma.done.wait [#allocation3], 256  }
   0xc   :  { %252 = vsyncadd [#allocation3], 4294967040 }
   0xd   :  { %253 = dma.done.wait [#allocation6], 2176  }
   0xe   :  { %254 = vsyncadd [#allocation6], 4294965120  ;;  %v77_v0 = vld [vmem:[#allocation5 + $0x78] sm:$0xff]  ;;  %v76_v1 = vld [vmem:[#allocation5 + $0x70] sm:$0xff]  ;;  %s262_s2 = smov [#allocation8]   ;;  %s119_s30 = sshll.u32 %s307_s3, 4  ;;  %s120_s30 = int_to_ptr.hbm [resolvable:$true] %s119_s30 }
   0xf   :  { %80 = vmatpush.msra.mxu0 %v77_v0  ;;  %133 = vmatpush.msra.mxu1 %v77_v0  ;;  %v75_v2 = vld [vmem:[#allocation5 + $0x68] sm:$0xff]  ;;  %v74_v3 = vld [vmem:[#allocation5 + $0x60] sm:$0xff]  ;;  %v73_v4 = vld [vmem:[#allocation5 + $0x58] sm:$0xff]  ;;  %s117_s27 = sshll.u32 %s262_s2, 4  ;;  %s118_s27 = int_to_ptr.vmem [resolvable:$true] %s117_s27 }
  0x10   :  { %v72_v5 = vld [vmem:[#allocation5 + $0x50] sm:$0xff]  ;;  %v71_v6 = vld [vmem:[#allocation5 + $0x48] sm:$0xff]  ;;  %v70_v7 = vld [vmem:[#allocation5 + $0x40] sm:$0xff] }
  0x11   :  { %81 = vmatpush.msra.mxu0 %v76_v1  ;;  %134 = vmatpush.msra.mxu1 %v76_v1  ;;  %v69_v8 = vld [vmem:[#allocation5 + $0x38] sm:$0xff]  ;;  %v68_v9 = vld [vmem:[#allocation5 + $0x30] sm:$0xff]  ;;  %v67_v10 = vld [vmem:[#allocation5 + $0x28] sm:$0xff] }
  0x12   :  { %v66_v11 = vld [vmem:[#allocation5 + $0x20] sm:$0xff]  ;;  %v65_v12 = vld [vmem:[#allocation5 + $0x18] sm:$0xff]  ;;  %v64_v13 = vld [vmem:[#allocation5 + $0x10] sm:$0xff] }
  0x13   :  { %82 = vmatpush.msra.mxu0 %v75_v2  ;;  %135 = vmatpush.msra.mxu1 %v75_v2  ;;  %v63_v14 = vld [vmem:[#allocation5 + $0x8] sm:$0xff]  ;;  %v62_v15 = vld [vmem:[#allocation5] sm:$0xff]  ;;  %v60_v16 = vld [vmem:[#allocation2] sm:$0xff] }
  0x14   :  { %v61_v17 = vld [vmem:[#allocation2 + $0x8] sm:$0xff]  ;;  %v78_v18 = vld [vmem:[#allocation7] sm:$0xff] }
  0x15   :  { %83 = vmatpush.msra.mxu0 %v74_v3  ;;  %136 = vmatpush.msra.mxu1 %v74_v3  ;;  %v79_v19 = vperm.slane %v78_v18, 0  ;;  %v105_v23 = vperm.slane %v78_v18, 1  ;;  %v108_v26 = vperm.slane %v78_v18, 2 }
  0x17   :  { %84 = vmatpush.msra.mxu0 %v73_v4  ;;  %137 = vmatpush.msra.mxu1 %v73_v4 }
  0x19   :  { %85 = vmatpush.msra.mxu0 %v72_v5  ;;  %138 = vmatpush.msra.mxu1 %v72_v5 }
  0x1b   :  { %86 = vmatpush.msra.mxu0 %v71_v6  ;;  %139 = vmatpush.msra.mxu1 %v71_v6 }
  0x1d   :  { %87 = vmatpush.msra.mxu0 %v70_v7  ;;  %140 = vmatpush.msra.mxu1 %v70_v7 }
  0x1f   :  { %88 = vmatpush.msra.mxu0 %v69_v8  ;;  %141 = vmatpush.msra.mxu1 %v69_v8 }
  0x21   :  { %89 = vmatpush.msra.mxu0 %v68_v9  ;;  %142 = vmatpush.msra.mxu1 %v68_v9 }
  0x23   :  { %90 = vmatpush.msra.mxu0 %v67_v10  ;;  %143 = vmatpush.msra.mxu1 %v67_v10 }
  0x25   :  { %91 = vmatpush.msra.mxu0 %v66_v11  ;;  %144 = vmatpush.msra.mxu1 %v66_v11 }
  0x27   :  { %92 = vmatpush.msra.mxu0 %v65_v12  ;;  %145 = vmatpush.msra.mxu1 %v65_v12 }
  0x29   :  { %93 = vmatpush.msra.mxu0 %v64_v13  ;;  %146 = vmatpush.msra.mxu1 %v64_v13 }
  0x2b   :  { %94 = vmatpush.msra.mxu0 %v63_v14  ;;  %147 = vmatpush.msra.mxu1 %v63_v14 }
  0x2d   :  { %95 = vmatpush.msra.mxu0 %v62_v15  ;;  %148 = vmatpush.msra.mxu1 %v62_v15 }
  0x2e   :  { %96 = vmatmul.f32.vlgmr.msra.gmra.mxu0 %v60_v16  ;;  %99 = vmatmul.f32.vlgmr.msra.gmra.mxu1 %v61_v17 }
  0xab   :  { %v97_v20 = vpop.f32.mrf.mxu0  ;;  %v100_v21 = vpop.f32.mrf.mxu1 }
  0xac   :  { %v98_v22 = vadd.f32 %v97_v20, %v79_v19  ;;  %v101_v24 = vadd.f32 %v100_v21, %v79_v19 }
  0xae   :  { %v103_v25 = vmax.f32 %v98_v22, 0.0  ;;  %v104_v27 = vmax.f32 %v101_v24, 0.0 }
  0xb0   :  { %v106_v28 = vmul.f32 %v105_v23, %v103_v25  ;;  %v107_v29 = vmul.f32 %v105_v23, %v104_v27 }
  0xb2   :  { %v109_v30 = vadd.f32 %v108_v26, %v106_v28  ;;  %v110_v31 = vadd.f32 %v108_v26, %v107_v29 }
  0xb4   :  { %111 = vst [vmem:[#allocation8] sm:$0xff] %v109_v30 }
  0xb5   :  { %112 = vst [vmem:[#allocation8 + $0x8] sm:$0xff] %v110_v31 }
  0xb6   :  { %125 = dma.vmem_to_hbm [thread:$0]  %s118_s27, 256, %s120_s30, [#allocation4], %s258_s20, %s258_s20, %s259_s21  }
  0xb7   :  { %255 = dma.done.wait [#allocation4], 256  }
  0xb8   :  { %256 = vsyncadd [#allocation4], 4294967040 }
  0xb9   :  { %130 = vsyncpa [#allocation3], 1 }
  0xba   :  { %131 = vsyncpa [#allocation6], 1 }
  0xbb   :  { %132 = vsyncpa [#allocation4], 1 }

</bundles_post_ra>
